<compile_context>
chip_gen: v7x
topology: tpu7x:2x2x1
jax: 0.10.0
libtpu: 0.0.40
codegen_flags: <defaults>
</compile_context>

<pallas_src>
import functools

import jax
import jax.numpy as jnp
from jax.experimental import pallas as pl
from jax.experimental.pallas import tpu as pltpu


def dim(shape):
    d = 1
    for s in shape:
        d *= s
    return d


# ----------------------------- Pallas kernel -------------------------------
def _sn3h_kernel(bound_ref, x_ref, w1_ref, b1_ref, w2_ref, b2_ref,
                 w3_ref, b3_ref, o_ref, *, afunc):
    """Fused fc1 -> afunc -> fc2 -> afunc -> fc3 -> hardtanh, all in VMEM."""
    bound = bound_ref[0, 0]  # SMEM scalar

    def dense(h_f32, w_ref, b_ref):
        # MXU matmul: bf16 operands, f32 accumulate; epilogue stays f32.
        y = jnp.dot(h_f32.astype(jnp.bfloat16), w_ref[...],
                    preferred_element_type=jnp.float32)
        return y + b_ref[...]

    h = afunc(dense(x_ref[...], w1_ref, b1_ref))
    h = afunc(dense(h, w2_ref, b2_ref))
    y = dense(h, w3_ref, b3_ref)
    # F.hardtanh(y, -bound, bound)
    o_ref[...] = jnp.clip(y, -bound, bound).astype(o_ref.dtype)


# ------------------------------- JAX glue ----------------------------------
def prepare_params(params):
    """One-time weight prep: transpose torch (out,in) -> (in,out), cast matmul
    operands to bf16, reshape biases to (1, N) f32.  Done outside the forward
    so inference has zero per-call weight preprocessing."""
    def wmat(w):
        return jnp.asarray(w, jnp.float32).T.astype(jnp.bfloat16)

    def bvec(b):
        return jnp.asarray(b, jnp.float32).reshape(1, -1)

    return {
        "w1": wmat(params["fc1_w"]), "b1": bvec(params["fc1_b"]),
        "w2": wmat(params["fc2_w"]), "b2": bvec(params["fc2_b"]),
        "w3": wmat(params["fc3_w"]), "b3": bvec(params["fc3_b"]),
    }


def sn3h_forward(kparams, x, bound, afunc=jax.nn.relu):
    """x: (N, *shape_in) -> (N, dim_out); single fused pallas_call."""
    n = x.shape[0]
    xf = x.reshape(n, -1).astype(jnp.float32)        # torch x.view(x.size(0), -1)
    dim_out = kparams["w3"].shape[1]
    bound_arr = jnp.asarray(bound, jnp.float32).reshape(1, 1)

    vmem = pl.BlockSpec(memory_space=pltpu.MemorySpace.VMEM)
    smem = pl.BlockSpec(memory_space=pltpu.MemorySpace.SMEM)

    kern = functools.partial(_sn3h_kernel, afunc=afunc)
    return pl.pallas_call(
        kern,
        out_shape=jax.ShapeDtypeStruct((n, dim_out), jnp.float32),
        in_specs=[smem, vmem, vmem, vmem, vmem, vmem, vmem, vmem],
        out_specs=vmem,
    )(bound_arr, xf,
      kparams["w1"], kparams["b1"],
      kparams["w2"], kparams["b2"],
      kparams["w3"], kparams["b3"])


# ----------------------------- Parameter init ------------------------------
def init_params(key, shape_in, dim_out, module_size, zero=False):
    assert module_size > 1, "module_size must be >= 2"
    dim_in = dim(shape_in)
    ks = jax.random.split(key, 6)

    def nrm(k, shp, s=0.05):
        return (s * jax.random.normal(k, shp)).astype(jnp.float32)

    p = {
        "fc1_w": nrm(ks[0], (module_size, dim_in)),
        "fc1_b": nrm(ks[1], (module_size,)),
        "fc2_w": nrm(ks[2], (module_size, module_size), s=0.1),
        "fc2_b": nrm(ks[3], (module_size,)),
        "fc3_w": nrm(ks[4], (dim_out, module_size), s=0.1),
        "fc3_b": nrm(ks[5], (dim_out,)),
    }
    if zero:
        p["fc3_w"] = jnp.zeros_like(p["fc3_w"])
        p["fc3_b"] = jnp.zeros_like(p["fc3_b"])
    return p


# --------------------------------- Main ------------------------------------
if __name__ == "__main__":
    shape_in = (4, 16, 16)   # (C, H, W) -> dim_in = 1024
    dim_out = 10
    module_size = 32
    bound = 2.0
    batch = 2

    key = jax.random.PRNGKey(0)
    pkey, xkey = jax.random.split(key)
    params = init_params(pkey, shape_in, dim_out, module_size)
    kparams = prepare_params(params)   # one-time weight prep (transpose + bf16)
    x = jax.random.normal(xkey, (batch,) + shape_in, dtype=jnp.float32)

    # TODO(synk): `afunc` in the torch module is an arbitrary callable; here it
    # must be a JAX-traceable function (relu used, tanh/sigmoid etc. also work).
    out = sn3h_forward(kparams, x, bound, afunc=jax.nn.relu)
    out = jax.block_until_ready(out)

    assert out.shape == (batch, dim_out), out.shape
    assert bool(jnp.all(jnp.abs(out) <= bound + 1e-5))
    print("KERNEL_OK")
</pallas_src>

<mosaic_0001>
module attributes {stable_mosaic.version = 11 : i64} {
  func.func @_sn3h_kernel(%arg0: memref<1x1xf32, #tpu.memory_space<smem>>, %arg1: memref<2x1024xf32, #tpu.memory_space<vmem>>, %arg2: memref<1024x32xbf16, #tpu.memory_space<vmem>>, %arg3: memref<1x32xf32, #tpu.memory_space<vmem>>, %arg4: memref<32x32xbf16, #tpu.memory_space<vmem>>, %arg5: memref<1x32xf32, #tpu.memory_space<vmem>>, %arg6: memref<32x10xbf16, #tpu.memory_space<vmem>>, %arg7: memref<1x10xf32, #tpu.memory_space<vmem>>, %arg8: memref<2x10xf32, #tpu.memory_space<vmem>>) attributes {dimension_semantics = [], scalar_prefetch = 0 : i64, scratch_operands = 0 : i64, tpu.core_type = #tpu.core_type<tc>} {
    %c0 = arith.constant 0 : index
    %c0_0 = arith.constant 0 : index
    %0 = memref.load %arg0[%c0, %c0_0] : memref<1x1xf32, #tpu.memory_space<smem>>
    %c0_1 = arith.constant 0 : index
    %c0_2 = arith.constant 0 : index
    %1 = vector.load %arg1[%c0_1, %c0_2] : memref<2x1024xf32, #tpu.memory_space<vmem>>, vector<2x1024xf32>
    %2 = arith.truncf %1 : vector<2x1024xf32> to vector<2x1024xbf16>
    %c0_3 = arith.constant 0 : index
    %c0_4 = arith.constant 0 : index
    %3 = vector.load %arg2[%c0_3, %c0_4] : memref<1024x32xbf16, #tpu.memory_space<vmem>>, vector<1024x32xbf16>
    %cst = arith.constant dense<0.000000e+00> : vector<2x32xf32>
    %4 = tpu.matmul %2, %3, %cst {dimension_numbers = #tpu.dot_dimension_numbers<[1], [0], [0], [1], [0, 0, 1, 1], [], []>} : vector<2x1024xbf16>, vector<1024x32xbf16>, vector<2x32xf32> -> vector<2x32xf32>
    %c0_5 = arith.constant 0 : index
    %c0_6 = arith.constant 0 : index
    %5 = vector.load %arg3[%c0_5, %c0_6] : memref<1x32xf32, #tpu.memory_space<vmem>>, vector<1x32xf32>
    %6 = vector.broadcast %5 : vector<1x32xf32> to vector<2x32xf32>
    %7 = arith.addf %4, %6 : vector<2x32xf32>
    %cst_7 = arith.constant 0.000000e+00 : f32
    %8 = vector.broadcast %cst_7 : f32 to vector<2x32xf32>
    %9 = arith.maximumf %7, %8 : vector<2x32xf32>
    %10 = arith.truncf %9 : vector<2x32xf32> to vector<2x32xbf16>
    %c0_8 = arith.constant 0 : index
    %c0_9 = arith.constant 0 : index
    %11 = vector.load %arg4[%c0_8, %c0_9] : memref<32x32xbf16, #tpu.memory_space<vmem>>, vector<32x32xbf16>
    %cst_10 = arith.constant dense<0.000000e+00> : vector<2x32xf32>
    %12 = tpu.matmul %10, %11, %cst_10 {dimension_numbers = #tpu.dot_dimension_numbers<[1], [0], [0], [1], [0, 0, 1, 1], [], []>} : vector<2x32xbf16>, vector<32x32xbf16>, vector<2x32xf32> -> vector<2x32xf32>
    %c0_11 = arith.constant 0 : index
    %c0_12 = arith.constant 0 : index
    %13 = vector.load %arg5[%c0_11, %c0_12] : memref<1x32xf32, #tpu.memory_space<vmem>>, vector<1x32xf32>
    %14 = vector.broadcast %13 : vector<1x32xf32> to vector<2x32xf32>
    %15 = arith.addf %12, %14 : vector<2x32xf32>
    %cst_13 = arith.constant 0.000000e+00 : f32
    %16 = vector.broadcast %cst_13 : f32 to vector<2x32xf32>
    %17 = arith.maximumf %15, %16 : vector<2x32xf32>
    %18 = arith.truncf %17 : vector<2x32xf32> to vector<2x32xbf16>
    %c0_14 = arith.constant 0 : index
    %c0_15 = arith.constant 0 : index
    %19 = vector.load %arg6[%c0_14, %c0_15] : memref<32x10xbf16, #tpu.memory_space<vmem>>, vector<32x10xbf16>
    %cst_16 = arith.constant dense<0.000000e+00> : vector<2x10xf32>
    %20 = tpu.matmul %18, %19, %cst_16 {dimension_numbers = #tpu.dot_dimension_numbers<[1], [0], [0], [1], [0, 0, 1, 1], [], []>} : vector<2x32xbf16>, vector<32x10xbf16>, vector<2x10xf32> -> vector<2x10xf32>
    %c0_17 = arith.constant 0 : index
    %c0_18 = arith.constant 0 : index
    %21 = vector.load %arg7[%c0_17, %c0_18] : memref<1x10xf32, #tpu.memory_space<vmem>>, vector<1x10xf32>
    %22 = vector.broadcast %21 : vector<1x10xf32> to vector<2x10xf32>
    %23 = arith.addf %20, %22 : vector<2x10xf32>
    %cst_19 = arith.constant 0.000000e+00 : f32
    %24 = arith.subf %cst_19, %0 : f32
    %25 = vector.broadcast %24 : f32 to vector<2x10xf32>
    %26 = arith.maximumf %25, %23 : vector<2x10xf32>
    %27 = vector.broadcast %0 : f32 to vector<2x10xf32>
    %28 = arith.minimumf %27, %26 : vector<2x10xf32>
    %c0_20 = arith.constant 0 : index
    %c0_21 = arith.constant 0 : index
    %29 = vector.load %arg8[%c0_20, %c0_21] : memref<2x10xf32, #tpu.memory_space<vmem>>, vector<2x10xf32>
    tpu.vector_store %arg8[%c0_20, %c0_21], %28 {strides = array<i32>} : memref<2x10xf32, #tpu.memory_space<vmem>>, vector<2x10xf32>,
    return
  }
}

</mosaic_0001>

<bundles_post_ra>
// kernel: tpu_custom_call.1
= control target key start
LH: loop header
LB: loop body
LE: loop exit
PB: predicated region body
PF: predicated region fallthrough
CT: control target
= control target key end

     0   :  { %v41_v28 = vlaneseq  ;;  %v1205_v36 = vmov 1983009808   ;;  %s1497_s0 = inlined_call_operand.<no memory space> [shape: f32[1,1], index: 0, kind: input, shape index: {}]   ;;  %s1498_s1 = inlined_call_operand.vmem [shape: f32[2,1024], index: 1, kind: input, shape index: {}]   ;;  %s1499_s2 = inlined_call_operand.vmem [shape: bf16[1024,32], index: 2, kind: input, shape index: {}]   ;;  %s1500_s3 = inlined_call_operand.vmem [shape: f32[1,32], index: 3, kind: input, shape index: {}]   ;;  %s1501_s4 = inlined_call_operand.vmem [shape: bf16[32,32], index: 4, kind: input, shape index: {}]   ;;  %s1502_s5 = inlined_call_operand.vmem [shape: f32[1,32], index: 5, kind: input, shape index: {}]   ;;  %s1503_s6 = inlined_call_operand.vmem [shape: bf16[32,10], index: 6, kind: input, shape index: {}]   ;;  %s1504_s7 = inlined_call_operand.vmem [shape: f32[1,10], index: 7, kind: input, shape index: {}]   ;;  %s1505_s8 = inlined_call_operand.hbm [shape: f32[2,10], index: 8, kind: output, shape index: {}]  }
   0x1   :  { %v1111_v0 = vld [vmem:[%s1499_s2 + $0x40] sm:$0xff]   ;;  %v1115_v4 = vld [vmem:[%s1499_s2 + $0x48] sm:$0xff]   ;;  %v1119_v8 = vld [vmem:[%s1499_s2 + $0x50] sm:$0xff]   ;;  %v39_v37 = vunpack.c.l.s4 %v1205_v36 }
   0x2   :  { %v1112_v1 = vld [vmem:[%s1499_s2 + $0xc0] sm:$0xff]   ;;  %997 = vmatprep.subr.bf16.mxu0 %v1111_v0  ;;  %v1116_v5 = vld [vmem:[%s1499_s2 + $0xc8] sm:$0xff]   ;;  %v1120_v9 = vld [vmem:[%s1499_s2 + $0xd0] sm:$0xff]   ;;  %v42_v33 = vshrl.u32 %v41_v28, 7 }
   0x3   :  { %v1113_v2 = vld [vmem:[%s1499_s2] sm:$0xff]   ;;  %1019 = vmatprep.subr.bf16.mxu1 %v1112_v1  ;;  %v1117_v6 = vld [vmem:[%s1499_s2 + $0x8] sm:$0xff]   ;;  %v1121_v10 = vld [vmem:[%s1499_s2 + $0x10] sm:$0xff]   ;;  %v40_v39 = vunpack.c.0.s8 %v39_v37 }
   0x4   :  { %v1114_v3 = vld [vmem:[%s1499_s2 + $0x80] sm:$0xff]   ;;  %998 = vmatpush3.bf16.msra.mxu0 %v1113_v2  ;;  %v1118_v7 = vld [vmem:[%s1499_s2 + $0x88] sm:$0xff]   ;;  %v1122_v11 = vld [vmem:[%s1499_s2 + $0x90] sm:$0xff]  }
   0x5   :  { %1020 = vmatpush3.bf16.msra.mxu1 %v1114_v3  ;;  %999 = vmatprep.subr.bf16.mxu0 %v1115_v4  ;;  %v1123_v12 = vld [vmem:[%s1499_s2 + $0x58] sm:$0xff]   ;;  %v1127_v16 = vld [vmem:[%s1499_s2 + $0x60] sm:$0xff]   ;;  %v1131_v20 = vld [vmem:[%s1499_s2 + $0x68] sm:$0xff]   ;;  %v1359_v41 = vsub.s32 %v40_v39, %v42_v33 }
   0x6   :  { %1021 = vmatprep.subr.bf16.mxu1 %v1116_v5  ;;  %v1124_v13 = vld [vmem:[%s1499_s2 + $0xd8] sm:$0xff]   ;;  %v1128_v17 = vld [vmem:[%s1499_s2 + $0xe0] sm:$0xff]   ;;  %v1132_v21 = vld [vmem:[%s1499_s2 + $0xe8] sm:$0xff]  }
   0x7   :  { %v1125_v14 = vld [vmem:[%s1499_s2 + $0x18] sm:$0xff]   ;;  %v1129_v18 = vld [vmem:[%s1499_s2 + $0x20] sm:$0xff]   ;;  %v1133_v22 = vld [vmem:[%s1499_s2 + $0x28] sm:$0xff]  }
   0x8   :  { %1000 = vmatpush3.bf16.msra.mxu0 %v1117_v6  ;;  %v1126_v15 = vld [vmem:[%s1499_s2 + $0x98] sm:$0xff]   ;;  %v1130_v19 = vld [vmem:[%s1499_s2 + $0xa0] sm:$0xff]   ;;  %v1134_v23 = vld [vmem:[%s1499_s2 + $0xa8] sm:$0xff]  }
   0x9   :  { %1022 = vmatpush3.bf16.msra.mxu1 %v1118_v7  ;;  %1001 = vmatprep.subr.bf16.mxu0 %v1119_v8  ;;  %v1135_v24 = vld [vmem:[%s1499_s2 + $0x70] sm:$0xff]   ;;  %v1139_v29 = vld [vmem:[%s1499_s2 + $0x78] sm:$0xff]   ;;  %v33_v34 = vld [vmem:[%s1498_s1] sm:$0xff] }
   0xa   :  { %1023 = vmatprep.subr.bf16.mxu1 %v1120_v9  ;;  %v1136_v25 = vld [vmem:[%s1499_s2 + $0xf0] sm:$0xff]   ;;  %v1140_v30 = vld [vmem:[%s1499_s2 + $0xf8] sm:$0xff]   ;;  %v1144_v35 = vld [vmem:[%s1499_s2 + $0x140] sm:$0xff]   ;;  %v37_v40 = vcombine.high %v33_v34, %v33_v34  ;;  %v44_v42 = vrot.slane %v33_v34, %v1359_v41 }
   0xb   :  { %v1137_v26 = vld [vmem:[%s1499_s2 + $0x30] sm:$0xff]   ;;  %v1141_v31 = vld [vmem:[%s1499_s2 + $0x38] sm:$0xff]   ;;  %v1145_v38 = vld [vmem:[%s1499_s2 + $0x1c0] sm:$0xff]  }
   0xc   :  { %1002 = vmatpush3.bf16.msra.mxu0 %v1121_v10  ;;  %v1138_v27 = vld [vmem:[%s1499_s2 + $0xb0] sm:$0xff]   ;;  %v1142_v32 = vld [vmem:[%s1499_s2 + $0xb8] sm:$0xff]   ;;  %v51_v43 = vrot.slane %v37_v40, %v1359_v41  ;;  %v52_v44 = vcombine.high %v44_v42, %v44_v42  ;;  %v1146_v46 = vld [vmem:[%s1499_s2 + $0x100] sm:$0xff]   ;;  %v79_v47 = vpack.c.bf16 %v44_v42, %v44_v42 }
   0xd   :  { %1024 = vmatpush3.bf16.msra.mxu1 %v1122_v11  ;;  %1003 = vmatprep.subr.bf16.mxu0 %v1123_v12  ;;  %v1147_v49 = vld [vmem:[%s1499_s2 + $0x180] sm:$0xff]   ;;  %v1148_v52 = vld [vmem:[%s1499_s2 + $0x148] sm:$0xff]   ;;  %v1152_v56 = vld [vmem:[%s1499_s2 + $0x150] sm:$0xff]  }
   0xe   :  { %1025 = vmatprep.subr.bf16.mxu1 %v1124_v13  ;;  %v53_v45 = vcombine.high %v51_v43, %v51_v43  ;;  %v81_v48 = vpack.c.bf16 %v51_v43, %v51_v43  ;;  %v80_v50 = vpack.c.bf16 %v52_v44, %v52_v44  ;;  %v1149_v53 = vld [vmem:[%s1499_s2 + $0x1c8] sm:$0xff]   ;;  %v1153_v57 = vld [vmem:[%s1499_s2 + $0x1d0] sm:$0xff]   ;;  %v1156_v60 = vld [vmem:[%s1499_s2 + $0x158] sm:$0xff]  }
   0xf   :  { %v1150_v54 = vld [vmem:[%s1499_s2 + $0x108] sm:$0xff]   ;;  %v1154_v58 = vld [vmem:[%s1499_s2 + $0x110] sm:$0xff]   ;;  %v1157_v61 = vld [vmem:[%s1499_s2 + $0x1d8] sm:$0xff]  }
  0x10   :  { %1004 = vmatpush3.bf16.msra.mxu0 %v1125_v14  ;;  %v82_v51 = vpack.c.bf16 %v53_v45, %v53_v45  ;;  %638 = vmatprep.mubr.bf16.mxu0 %v80_v50  ;;  %v1151_v55 = vld [vmem:[%s1499_s2 + $0x188] sm:$0xff]   ;;  %v1155_v59 = vld [vmem:[%s1499_s2 + $0x190] sm:$0xff]   ;;  %v1158_v62 = vld [vmem:[%s1499_s2 + $0x118] sm:$0xff]  }
  0x11   :  { %1026 = vmatpush3.bf16.msra.mxu1 %v1126_v15  ;;  %1005 = vmatprep.subr.bf16.mxu0 %v1127_v16  ;;  %v1159_v63 = vld [vmem:[%s1499_s2 + $0x198] sm:$0xff]   ;;  %v1160_v0 = vld [vmem:[%s1499_s2 + $0x160] sm:$0xff]   ;;  %v1164_v4 = vld [vmem:[%s1499_s2 + $0x168] sm:$0xff]  }
  0x12   :  { %1027 = vmatprep.subr.bf16.mxu1 %v1128_v17  ;;  %678 = vmatprep.mubr.bf16.mxu1 %v82_v51  ;;  %v1161_v1 = vld [vmem:[%s1499_s2 + $0x1e0] sm:$0xff]   ;;  %v1165_v5 = vld [vmem:[%s1499_s2 + $0x1e8] sm:$0xff]   ;;  %v1168_v8 = vld [vmem:[%s1499_s2 + $0x170] sm:$0xff]  }
  0x13   :  { %v1162_v2 = vld [vmem:[%s1499_s2 + $0x120] sm:$0xff]   ;;  %v1166_v6 = vld [vmem:[%s1499_s2 + $0x128] sm:$0xff]   ;;  %v1169_v9 = vld [vmem:[%s1499_s2 + $0x1f0] sm:$0xff]  }
  0x14   :  { %1006 = vmatpush3.bf16.msra.mxu0 %v1129_v18  ;;  %v1163_v3 = vld [vmem:[%s1499_s2 + $0x1a0] sm:$0xff]   ;;  %v1167_v7 = vld [vmem:[%s1499_s2 + $0x1a8] sm:$0xff]   ;;  %v1170_v11 = vld [vmem:[%s1499_s2 + $0x130] sm:$0xff]  }
  0x15   :  { %1028 = vmatpush3.bf16.msra.mxu1 %v1130_v19  ;;  %1007 = vmatprep.subr.bf16.mxu0 %v1131_v20  ;;  %v34_v10 = vld [vmem:[%s1498_s1 + $0x8] sm:$0xff]  ;;  %v1171_v14 = vld [vmem:[%s1499_s2 + $0x1b0] sm:$0xff]  }
  0x16   :  { %1029 = vmatprep.subr.bf16.mxu1 %v1132_v21  ;;  %v61_v12 = vrot.slane %v34_v10, %v1359_v41  ;;  %v54_v13 = vcombine.high %v34_v10, %v34_v10 }
  0x18   :  { %1008 = vmatpush3.bf16.msra.mxu0 %v1133_v22  ;;  %v69_v15 = vcombine.high %v61_v12, %v61_v12  ;;  %v68_v16 = vrot.slane %v54_v13, %v1359_v41 }
  0x19   :  { %1030 = vmatpush3.bf16.msra.mxu1 %v1134_v23  ;;  %1009 = vmatprep.subr.bf16.mxu0 %v1135_v24 }
  0x1a   :  { %1031 = vmatprep.subr.bf16.mxu1 %v1136_v25 }
  0x1c   :  { %1010 = vmatpush3.bf16.msra.mxu0 %v1137_v26 }
  0x1d   :  { %1032 = vmatpush3.bf16.msra.mxu1 %v1138_v27  ;;  %1011 = vmatprep.subr.bf16.mxu0 %v1139_v29 }
  0x1e   :  { %1033 = vmatprep.subr.bf16.mxu1 %v1140_v30 }
  0x20   :  { %1012 = vmatpush3.bf16.msra.mxu0 %v1141_v31 }
  0x21   :  { %1034 = vmatpush3.bf16.msra.mxu1 %v1142_v32  ;;  %1041 = vmatprep.subr.bf16.mxu0 %v1144_v35 }
  0x22   :  { %1063 = vmatprep.subr.bf16.mxu1 %v1145_v38 }
  0x23   :  { %639 = vmatmul.mubr.bf16.vlgmr.msra.gmra.mrb[0].mxu0 %v79_v47 }
  0x24   :  { %679 = vmatmul.mubr.bf16.vlgmr.msra.gmra.mrb[0].mxu1 %v81_v48  ;;  %1042 = vmatpush3.bf16.msra.mxu0 %v1146_v46 }
  0x25   :  { %1064 = vmatpush3.bf16.msra.mxu1 %v1147_v49  ;;  %1043 = vmatprep.subr.bf16.mxu0 %v1148_v52 }
  0x26   :  { %1065 = vmatprep.subr.bf16.mxu1 %v1149_v53 }
  0x28   :  { %1044 = vmatpush3.bf16.msra.mxu0 %v1150_v54 }
  0x29   :  { %1066 = vmatpush3.bf16.msra.mxu1 %v1151_v55  ;;  %1045 = vmatprep.subr.bf16.mxu0 %v1152_v56 }
  0x2a   :  { %1067 = vmatprep.subr.bf16.mxu1 %v1153_v57 }
  0x2c   :  { %1046 = vmatpush3.bf16.msra.mxu0 %v1154_v58 }
  0x2d   :  { %1068 = vmatpush3.bf16.msra.mxu1 %v1155_v59  ;;  %1047 = vmatprep.subr.bf16.mxu0 %v1156_v60 }
  0x2e   :  { %1069 = vmatprep.subr.bf16.mxu1 %v1157_v61 }
  0x30   :  { %1048 = vmatpush3.bf16.msra.mxu0 %v1158_v62 }
  0x31   :  { %1070 = vmatpush3.bf16.msra.mxu1 %v1159_v63  ;;  %1049 = vmatprep.subr.bf16.mxu0 %v1160_v0 }
  0x32   :  { %1071 = vmatprep.subr.bf16.mxu1 %v1161_v1 }
  0x34   :  { %1050 = vmatpush3.bf16.msra.mxu0 %v1162_v2 }
  0x35   :  { %1072 = vmatpush3.bf16.msra.mxu1 %v1163_v3  ;;  %1051 = vmatprep.subr.bf16.mxu0 %v1164_v4 }
  0x36   :  { %1073 = vmatprep.subr.bf16.mxu1 %v1165_v5 }
  0x38   :  { %1052 = vmatpush3.bf16.msra.mxu0 %v1166_v6 }
  0x39   :  { %1074 = vmatpush3.bf16.msra.mxu1 %v1167_v7 }
  0x3a   :  { %14 = vsyncpa [#allocation4], 0  ;;  %1053 = vmatprep.subr.bf16.mxu0 %v1168_v8  ;;  %1075 = vmatprep.subr.bf16.mxu1 %v1169_v9  ;;  %v1172_v17 = vld [vmem:[%s1499_s2 + $0x178] sm:$0xff]   ;;  %v84_v19 = vpack.c.bf16 %v69_v15, %v69_v15  ;;  %v70_v20 = vcombine.high %v68_v16, %v68_v16  ;;  %v83_v24 = vpack.c.bf16 %v61_v12, %v61_v12  ;;  %v1177_v26 = vld [vmem:[%s1501_s4] sm:$0xff]   ;;  %v1206_v27 = vmov 0.0   ;;  %s903_s15 = ssub.f32 0.0, %s1497_s0 }
  0x3b   :  { %v1173_v18 = vld [vmem:[%s1499_s2 + $0x1f8] sm:$0xff]   ;;  %v85_v25 = vpack.c.bf16 %v68_v16, %v68_v16  ;;  %v1178_v28 = vld [vmem:[%s1501_s4 + $0x8] sm:$0xff]   ;;  %vm1207_vm0 = vmmov 0   ;;  %v1179_v29 = vld [vmem:[%s1503_s6] sm:$0xff]   ;;  %vm791_vm1 = vcmask 261120   ;;  %v906_v8 = vstv %s1497_s0  ;;  %s1208_s18 = smov [#allocation3]  }
  0x3c   :  { %1054 = vmatpush3.bf16.msra.mxu0 %v1170_v11  ;;  %v1174_v21 = vld [vmem:[%s1499_s2 + $0x138] sm:$0xff]   ;;  %v86_v23 = vpack.c.bf16 %v70_v20, %v70_v20  ;;  %718 = vmatprep.mubr.bf16.mxu0 %v84_v19  ;;  %v924_v32 = vld [vmem:[%s1500_s3] ss:$0 sm:$0xff]  ;;  %v1180_v57 = vld [vmem:[%s1503_s6 + $0x8] sm:$0xff]   ;;  %v904_v4 = vstv %s903_s15  ;;  %s916_s1 = sshll.u32 %s1208_s18, 4  ;;  %vm908_vm2 = vcmask 74752   ;;  %s917_s1 = int_to_ptr.vmem [resolvable:$true] %s916_s1 }
  0x3d   :  { %1076 = vmatpush3.bf16.msra.mxu1 %v1171_v14  ;;  %v1175_v22 = vld [vmem:[%s1499_s2 + $0x1b8] sm:$0xff]   ;;  %1055 = vmatprep.subr.bf16.mxu0 %v1172_v17  ;;  %v989_v58 = vld [vmem:[%s1502_s5] ss:$0 sm:$0xff]  ;;  %s1181_s19 = scalar_lea.vmem %s917_s1, 32  ;;  %p1186_p1 = scmp.lt.s32.totalorder %s917_s1, %s917_s1 }
  0x3e   :  { %1077 = vmatprep.subr.bf16.mxu1 %v1173_v18  ;;  %758 = vmatprep.mubr.bf16.mxu1 %v86_v23  ;;  %v993_v2 = vld [vmem:[%s1504_s7] ss:$0 sm:$0xff]  ;;  %p1182_p0 = scmp.ne.s32.totalorder %s917_s1, %s1181_s19  ;;  %p1187_p2 = scmp.lt.s32.totalorder %s1181_s19, %s1181_s19 }
  0x40   :  { %1056 = vmatpush3.bf16.msra.mxu0 %v1174_v21  ;;  %p1188_p3 = por %p1187_p2, %p1186_p1 }
  0x41   :  { %1078 = vmatpush3.bf16.msra.mxu1 %v1175_v22  ;;  %1091 = vmatprep.subr.bf16.mxu0 %v1206_v27 }
  0x42   :  { %1099 = vmatprep.subr.bf16.mxu1 %v1206_v27  ;;  %p1189_p4 = pnand %p1188_p3, %p1182_p0 }
  0x43   :  { %719 = vmatmul.mubr.bf16.vlgmr.msra.gmra.mrb[4].mxu0 %v83_v24 }
  0x44   :  { %759 = vmatmul.mubr.bf16.vlgmr.msra.gmra.mrb[4].mxu1 %v85_v25  ;;  %1092 = vmatpush3.bf16.msra.mxu0 %v1177_v26 }
  0x45   :  { %1093 = vmatprep.subr.bf16.mxu0 %v1206_v27  ;;  %1095 = vmatprep.mubr.msk.bf16.mxu0 %vm1207_vm0, %v1206_v27 }
  0x46   :  { %1103 = vmatprep.mubr.msk.bf16.mxu1 %vm1207_vm0, %v1206_v27  ;;  %1100 = vmatpush3.bf16.msra.mxu1 %v1179_v29 }
  0x47   :  { %1101 = vmatprep.subr.bf16.mxu1 %v1206_v27 }
  0x48   :  { %1094 = vmatpush3.bf16.msra.mxu0 %v1178_v28 }
  0x4a   :  { %1102 = vmatpush3.bf16.msra.mxu1 %v1180_v57 }
  0xf6   :  { %v1013_v30 = vpop.f32.mrb[0].mxu0 }
  0xf7   :  { %v1035_v31 = vpop.f32.mrb[0].mxu1  ;;  %v1014_v33 = vpop.f32.mrb[1].mxu0 }
  0xf8   :  { %v1036_v34 = vpop.f32.mrb[1].mxu1  ;;  %v1015_v35 = vadd.f32 %v1014_v33, %v1013_v30  ;;  %v1016_v37 = vpop.f32.mrb[2].mxu0 }
  0xf9   :  { %v1037_v36 = vadd.f32 %v1036_v34, %v1035_v31  ;;  %v1038_v38 = vpop.f32.mrb[2].mxu1  ;;  %v1017_v39 = vpop.f32.mrb[3].mxu0 }
  0xfa   :  { %v1039_v40 = vpop.f32.mrb[3].mxu1  ;;  %v641_v41 = vadd.f32 %v1015_v35, %v924_v32 }
  0xfc   :  { %v681_v42 = vadd.f32 %v1037_v36, %v641_v41 }
 0x116   :  { %v1057_v43 = vpop.f32.mrb[4].mxu0 }
 0x117   :  { %v1079_v44 = vpop.f32.mrb[4].mxu1  ;;  %v1058_v45 = vpop.f32.mrb[5].mxu0 }
 0x118   :  { %v1080_v46 = vpop.f32.mrb[5].mxu1  ;;  %v1059_v47 = vadd.f32 %v1058_v45, %v1057_v43  ;;  %v1060_v49 = vpop.f32.mrb[6].mxu0 }
 0x119   :  { %v1081_v48 = vadd.f32 %v1080_v46, %v1079_v44  ;;  %v1082_v50 = vpop.f32.mrb[6].mxu1  ;;  %v1061_v51 = vpop.f32.mrb[7].mxu0 }
 0x11a   :  { %v1083_v52 = vpop.f32.mrb[7].mxu1  ;;  %v721_v53 = vadd.f32 %v1059_v47, %v681_v42 }
 0x11c   :  { %v761_v54 = vadd.f32 %v1081_v48, %v721_v53 }
 0x11e   :  { %v766_v55 = vmax.f32 %v761_v54, 0.0 }
 0x120   :  { %v767_v56 = vpack.c.bf16 %v766_v55, %v766_v55 }
 0x122   :  { %1096 = vmatmul.mubr.msk.bf16.vlgmr.msra.gmra.mrb[8].mxu0 %vm791_vm1, %v767_v56 }
 0x1f5   :  { %v829_v59 = vpop.f32.mrb[8].mxu0 }
 0x1f6   :  { %v830_v60 = vadd.f32 %v989_v58, %v829_v59  ;;  %v1097_v61 = vpop.f32.mrb[9].mxu0 }
 0x1f7   :  { %v832_v62 = vpop.f32.mrb[10].mxu0 }
 0x1f8   :  { %v835_v63 = vmax.f32 %v830_v60, 0.0  ;;  %v1098_v0 = vpop.f32.mrb[11].mxu0 }
 0x1fa   :  { %v836_v1 = vpack.c.bf16 %v835_v63, %v835_v63 }
 0x1fc   :  { %1104 = vmatmul.mubr.msk.bf16.vlgmr.msra.gmra.mrb[8].mxu1 %vm791_vm1, %v836_v1 }
 0x2cf   :  { %v897_v3 = vpop.f32.mrb[8].mxu1 }
 0x2d0   :  { %v898_v5 = vadd.f32 %v993_v2, %v897_v3  ;;  %v1105_v6 = vpop.f32.mrb[9].mxu1 }
 0x2d1   :  { %v900_v7 = vpop.f32.mrb[10].mxu1 }
 0x2d2   :  { %v905_v9 = vmax.f32 %v904_v4, %v898_v5  ;;  %v1106_v10 = vpop.f32.mrb[11].mxu1 }
 0x2d4   :  { %v907_v11 = vmin.f32 %v906_v8, %v905_v9 }
 0x2d6   :  { %909 = vst.msk [vmem:[#allocation3] sm:$0x3] %vm908_vm2, %v907_v11 }
 0x2d7   :  { %1192 = shalt.err (!%p1189_p4)
}
 0x2d8   :  { %s1193_s21 = scalar_lea.hbm %s1505_s8, 32 }
 0x2d9   :  { %p1194_p5 = scmp.ne.s32.totalorder %s1505_s8, %s1193_s21  ;;  %p1197_p6 = scmp.lt.u32.totalorder %s1193_s21, %s1505_s8 }
 0x2db   :  { %p1199_p7 = pnand %p1197_p6, %p1194_p5 }
 0x2dd   :  { %1202 = shalt.err (!%p1199_p7)
}
 0x2de   :  { %919 = dma.vmem_to_hbm [thread:$0]  %s917_s1, 32, %s1505_s8, [#allocation4]  }
 0x2df   :  { %1203 = dma.done.wait [#allocation4], 32  }
 0x2e0   :  { %1204 = vsyncadd [#allocation4], 4294967264 }
 0x2e1   :  { %923 = vsyncpa [#allocation4], 1 }

</bundles_post_ra>
